<compile_context>
chip_gen: v7x
topology: tpu7x:2x2x1
jax: 0.10.0
libtpu: 0.0.40
codegen_flags: <defaults>
</compile_context>

<pallas_src>
import functools

import jax
import jax.numpy as jnp
from jax.experimental import pallas as pl
from jax.experimental.pallas import tpu as pltpu

F2 = 16      # channels (module hard-wires in_channels = out_channels = F2)
KW = 16      # depthwise kernel width (1, 16)
PAD = 8      # conv padding (0, 8)
POOL = 8     # avg_pool2d kernel (1, 8)
BN_EPS = 1e-3


def _temporal_kernel(x_ref, wf_ref, bias_ref, pool_ref, out_ref, im_s, *,
                     n_tile, t_pad):
    # x_ref:    (1, C, L + KW)       padded, batch-concatenated slab (compute dtype)
    # wf_ref:   (C, KW*C)            fused dw+pw weights, BN scale folded in
    # bias_ref: (C, 1)               folded BN shift (f32)
    # pool_ref: (L, n_tile*t_pool)   block-diagonal averaging matrix (f32)
    # out_ref:  (1, C, n_tile*t_pool)
    # im_s:     VMEM (KW*C, L)       im2col scratch (compute dtype)
    c = F2
    l = n_tile * t_pad

    # Build the im2col operand: row block k holds the slab shifted left by k
    # taps.  Static-offset lane slices lower to the same XLU lane rotates as
    # pltpu.roll, but with wrap-free semantics (the wrapper appends KW zero
    # lanes so k:k+l never runs off the slab).  Columns that mix batches or
    # the conv tail are finite and get zero weight in the pooling matmul.
    for k in range(KW):
        im_s[k * c:(k + 1) * c, :] = x_ref[0, :, k:k + l]

    # Single fused depthwise+pointwise(+BN scale) conv matmul: K = KW*C = 256.
    z = jnp.dot(wf_ref[...], im_s[...], preferred_element_type=jnp.float32)
    z = z + bias_ref[...]                       # folded BN shift (f32)

    # ELU (alpha = 1).  Clamp the unselected branch so exp() never sees large
    # positive values (stays finite without relying on expm1 lowering).
    z = jnp.where(z > 0, z, jnp.exp(jnp.minimum(z, 0.0)) - 1.0)

    # AvgPool2d((1, 8)) for all n_tile batches at once + masking of junk
    # columns, as one (C, L) @ (L, n_tile*t_pool) matmul -> one batched store.
    out_ref[0] = jnp.dot(z, pool_ref[...],
                         preferred_element_type=jnp.float32).astype(out_ref.dtype)


def _pick_layout(batch):
    """Generation-aware defaults: (n_tile, compute_dtype)."""
    try:
        kind = jax.devices()[0].device_kind.lower()
    except Exception:
        kind = ""
    single_tc = any(s in kind for s in
                    ("v2", "v3", "v5e", "v5 lite", "v5lite",
                     "v6e", "v6 lite", "v6lite"))
    if single_tc or batch % 2:
        n_tile = batch            # one grid step: single TC, saves ~0.35us/step
    else:
        n_tile = batch // 2       # 2 "parallel" steps keep both TCs busy (v7x/megacore)
    is_v5e = any(s in kind for s in ("v5e", "v5 lite", "v5lite"))
    return n_tile, (jnp.bfloat16 if is_v5e else jnp.float32)


def temporal_layer(x_nchw, w_dw, w_pw, gamma, beta, run_mean, run_var, *,
                   compute_dtype=None, n_tile=None):
    """x_nchw: (N, F2, 1, T).  Returns (N, F2 * ((T + 2*PAD - KW + 1) // POOL))."""
    N, C, H, T = x_nchw.shape
    assert C == F2 and H == 1
    t_pad = T + 2 * PAD                 # padded conv input length
    t_out = t_pad - KW + 1              # depthwise conv output length (= T + 1)
    t_pool = t_out // POOL              # avg-pool output length

    auto_tile, auto_dtype = _pick_layout(N)
    if n_tile is None:
        n_tile = auto_tile
    if compute_dtype is None:
        compute_dtype = auto_dtype
    assert N % n_tile == 0
    steps = N // n_tile
    L = n_tile * t_pad

    # --- wrapper-side layout plumbing (tiny XLA ops) ---------------------------
    # Zero-pad the time axis, concatenate each grid step's n_tile batches along
    # the lane axis, and append KW zero lanes so in-kernel tap slices never wrap.
    x = x_nchw.reshape(N, C, T)
    xpad = jnp.pad(x, ((0, 0), (0, 0), (PAD, PAD)))                      # (N, C, t_pad)
    xk = (xpad.reshape(steps, n_tile, C, t_pad)
              .transpose(0, 2, 1, 3)
              .reshape(steps, C, L))
    xk = jnp.pad(xk, ((0, 0), (0, 0), (0, KW))).astype(compute_dtype)    # (steps, C, L+KW)

    # --- fold inference BatchNorm into the conv weights / a bias ---------------
    inv_std = jax.lax.rsqrt(run_var.astype(jnp.float32) + BN_EPS)
    scale = gamma.astype(jnp.float32) * inv_std                          # (C,)
    shift = beta.astype(jnp.float32) - run_mean.astype(jnp.float32) * scale

    wdw = w_dw.reshape(C, KW).astype(jnp.float32)     # depthwise taps   (c, k)
    wpw = w_pw.reshape(C, C).astype(jnp.float32)      # pointwise mix    (o, c)
    # Lane-dense fused weight: wf[o, k*C + c] = scale[o] * wpw[o, c] * wdw[c, k]
    wf = (scale[:, None, None] * wpw[:, None, :] * wdw.T[None, :, :])    # (o, k, c)
    wf = wf.reshape(C, KW * C).astype(compute_dtype)
    bias = shift.reshape(C, 1)                                           # (C, 1) f32

    # --- block-diagonal averaging matrix: pooling + batch/tail masking ---------
    # pool[b*t_pad + t, b'*t_pool + q] = 1/POOL iff b == b' and
    # q*POOL <= t < (q+1)*POOL (trailing partial window dropped, ceil_mode=False).
    j = jnp.arange(L)
    m = jnp.arange(n_tile * t_pool)
    bj, tj = j // t_pad, j % t_pad
    bm, qm = m // t_pool, m % t_pool
    pool_mat = jnp.where((bj[:, None] == bm[None, :])
                         & (tj[:, None] >= qm[None, :] * POOL)
                         & (tj[:, None] < (qm[None, :] + 1) * POOL),
                         1.0 / POOL, 0.0).astype(jnp.float32)            # (L, n_tile*t_pool)

    kernel = functools.partial(_temporal_kernel, n_tile=n_tile, t_pad=t_pad)

    # Per-step VMEM: double-buffered (C, L+KW) slab + (KW*C, L) im2col scratch
    # + weights/pool/output -> KB-to-sub-MB scale, far under the scoped-VMEM
    # defaults on v5e/v6e and under v7x's smaller 64 MiB physical budget.
    # TODO(synk): for very long T, additionally tile the time axis with a KW-1
    # halo in the index_map; size that tile against v7x's 64 MiB VMEM (or set
    # vmem_limit_bytes), not v5e/v6e's 128 MiB.
    out_k = pl.pallas_call(
        kernel,
        out_shape=jax.ShapeDtypeStruct((steps, C, n_tile * t_pool), x_nchw.dtype),
        grid_spec=pltpu.PrefetchScalarGridSpec(
            num_scalar_prefetch=0,
            grid=(steps,),
            in_specs=[
                pl.BlockSpec((1, C, L + KW), lambda i: (i, 0, 0)),
                pl.BlockSpec((C, KW * C), lambda i: (0, 0)),
                pl.BlockSpec((C, 1), lambda i: (0, 0)),
                pl.BlockSpec((L, n_tile * t_pool), lambda i: (0, 0)),
            ],
            out_specs=pl.BlockSpec((1, C, n_tile * t_pool), lambda i: (i, 0, 0)),
            scratch_shapes=[pltpu.VMEM((KW * C, L), compute_dtype)],
        ),
        compiler_params=pltpu.CompilerParams(
            dimension_semantics=("parallel",)),
    )(xk, wf, bias, pool_mat)

    # out_k[i, o, b*t_pool + q]  ->  torch.flatten(h3, start_dim=1) channel-major
    # layout; a ~2 KB wrapper-side transpose (layout plumbing, not compute).
    out = (out_k.reshape(steps, C, n_tile, t_pool)
                .transpose(0, 2, 1, 3)
                .reshape(N, C * t_pool))
    # TODO(synk): training-mode Dropout / batch-statistic BatchNorm not modeled.
    return out


def _reference(x_nchw, w_dw, w_pw, gamma, beta, rm, rv):
    """Plain-JAX reference using lax convolutions (eval-mode semantics)."""
    y = jax.lax.conv_general_dilated(
        x_nchw, w_dw, (1, 1), ((0, 0), (PAD, PAD)),
        feature_group_count=F2, dimension_numbers=("NCHW", "OIHW", "NCHW"))
    z = jax.lax.conv_general_dilated(
        y, w_pw, (1, 1), ((0, 0), (0, 0)),
        dimension_numbers=("NCHW", "OIHW", "NCHW"))
    z = (z - rm[None, :, None, None]) * jax.lax.rsqrt(rv[None, :, None, None] + BN_EPS)
    z = z * gamma[None, :, None, None] + beta[None, :, None, None]
    z = jnp.where(z > 0, z, jnp.expm1(z))
    n, c, h, t = z.shape
    tp = t // POOL
    z = z[:, :, :, : tp * POOL].reshape(n, c, h, tp, POOL).mean(-1)
    return z.reshape(n, -1)


if __name__ == "__main__":
    key = jax.random.PRNGKey(0)
    k1, k2, k3, k4, k5, k6, k7 = jax.random.split(key, 7)
    # Module defaults: samples=256 -> this layer sees T = samples // 4 = 64
    # time steps and fdim = F2 * (samples // 32) = 128.  Batch kept small.
    N, T = 4, 64
    x = jax.random.normal(k1, (N, F2, 1, T), jnp.float32)
    w_dw = 0.1 * jax.random.normal(k2, (F2, 1, 1, KW), jnp.float32)   # depthwise
    w_pw = 0.1 * jax.random.normal(k3, (F2, F2, 1, 1), jnp.float32)   # pointwise
    gamma = 1.0 + 0.1 * jax.random.normal(k4, (F2,), jnp.float32)
    beta = 0.1 * jax.random.normal(k5, (F2,), jnp.float32)
    run_mean = 0.1 * jax.random.normal(k6, (F2,), jnp.float32)
    run_var = jnp.abs(1.0 + 0.1 * jax.random.normal(k7, (F2,), jnp.float32))

    ref = _reference(x, w_dw, w_pw, gamma, beta, run_mean, run_var)
    t_pool = (T + 2 * PAD - KW + 1) // POOL

    # float32 path, generation-default grid (single step on v5e/v6e, 2 on v7x).
    out32 = jax.block_until_ready(
        temporal_layer(x, w_dw, w_pw, gamma, beta, run_mean, run_var,
                       compute_dtype=jnp.float32))
    assert out32.shape == (N, F2 * t_pool), out32.shape
    assert jnp.all(jnp.isfinite(out32))
    assert jnp.allclose(out32, ref, atol=5e-4, rtol=5e-4), float(
        jnp.max(jnp.abs(out32 - ref)))

    # float32 path, forced 2-step "parallel" grid (exercises the v7x layout).
    out32b = jax.block_until_ready(
        temporal_layer(x, w_dw, w_pw, gamma, beta, run_mean, run_var,
                       compute_dtype=jnp.float32, n_tile=N // 2))
    assert out32b.shape == (N, F2 * t_pool), out32b.shape
    assert jnp.allclose(out32b, ref, atol=5e-4, rtol=5e-4), float(
        jnp.max(jnp.abs(out32b - ref)))

    # bfloat16 matmul-operand path (f32 accumulation + f32 elementwise).
    out16 = jax.block_until_ready(
        temporal_layer(x, w_dw, w_pw, gamma, beta, run_mean, run_var,
                       compute_dtype=jnp.bfloat16))
    assert out16.shape == (N, F2 * t_pool), out16.shape
    assert jnp.all(jnp.isfinite(out16))
    assert jnp.allclose(out16, ref, atol=5e-2, rtol=5e-2), float(
        jnp.max(jnp.abs(out16 - ref)))

    print("KERNEL_OK")
</pallas_src>

<mosaic_0001>
module attributes {stable_mosaic.version = 11 : i64} {
  func.func @_temporal_kernel(%arg0: i32, %arg1: memref<1x16x176xf32, #tpu.memory_space<vmem>>, %arg2: memref<16x256xf32, #tpu.memory_space<vmem>>, %arg3: memref<16x1xf32, #tpu.memory_space<vmem>>, %arg4: memref<160x16xf32, #tpu.memory_space<vmem>>, %arg5: memref<1x16x16xf32, #tpu.memory_space<vmem>>, %arg6: memref<256x160xf32, #tpu.memory_space<vmem>>) attributes {dimension_semantics = [#tpu.dimension_semantics<parallel>], iteration_bounds = array<i64: 2>, scalar_prefetch = 0 : i64, scratch_operands = 1 : i64, tpu.core_type = #tpu.core_type<tc>, window_params = [{transform_indices = @transform_0, window_bounds = array<i64: 1, 16, 176>}, {pipeline_mode = #tpu.pipeline_mode<synchronous>, transform_indices = @transform_1, window_bounds = array<i64: 16, 256>}, {pipeline_mode = #tpu.pipeline_mode<synchronous>, transform_indices = @transform_2, window_bounds = array<i64: 16, 1>}, {pipeline_mode = #tpu.pipeline_mode<synchronous>, transform_indices = @transform_3, window_bounds = array<i64: 160, 16>}, {transform_indices = @transform_4, window_bounds = array<i64: 1, 16, 16>}]} {
    %c0 = arith.constant 0 : index
    %c0_0 = arith.constant 0 : index
    %c0_1 = arith.constant 0 : index
    %0 = vector.load %arg1[%c0, %c0_0, %c0_1] : memref<1x16x176xf32, #tpu.memory_space<vmem>>, vector<1x16x160xf32>
    %1 = vector.shape_cast %0 : vector<1x16x160xf32> to vector<16x160xf32>
    %c0_2 = arith.constant 0 : index
    %c0_3 = arith.constant 0 : index
    %2 = vector.load %arg6[%c0_2, %c0_3] : memref<256x160xf32, #tpu.memory_space<vmem>>, vector<16x160xf32>
    tpu.vector_store %arg6[%c0_2, %c0_3], %1 {strides = array<i32>} : memref<256x160xf32, #tpu.memory_space<vmem>>, vector<16x160xf32>,
    %c0_4 = arith.constant 0 : index
    %c0_5 = arith.constant 0 : index
    %c1 = arith.constant 1 : index
    %3 = vector.load %arg1[%c0_4, %c0_5, %c1] : memref<1x16x176xf32, #tpu.memory_space<vmem>>, vector<1x16x160xf32>
    %4 = vector.shape_cast %3 : vector<1x16x160xf32> to vector<16x160xf32>
    %c16 = arith.constant 16 : index
    %c0_6 = arith.constant 0 : index
    %5 = vector.load %arg6[%c16, %c0_6] : memref<256x160xf32, #tpu.memory_space<vmem>>, vector<16x160xf32>
    tpu.vector_store %arg6[%c16, %c0_6], %4 {strides = array<i32>} : memref<256x160xf32, #tpu.memory_space<vmem>>, vector<16x160xf32>,
    %c0_7 = arith.constant 0 : index
    %c0_8 = arith.constant 0 : index
    %c2 = arith.constant 2 : index
    %6 = vector.load %arg1[%c0_7, %c0_8, %c2] : memref<1x16x176xf32, #tpu.memory_space<vmem>>, vector<1x16x160xf32>
    %7 = vector.shape_cast %6 : vector<1x16x160xf32> to vector<16x160xf32>
    %c32 = arith.constant 32 : index
    %c0_9 = arith.constant 0 : index
    %8 = vector.load %arg6[%c32, %c0_9] : memref<256x160xf32, #tpu.memory_space<vmem>>, vector<16x160xf32>
    tpu.vector_store %arg6[%c32, %c0_9], %7 {strides = array<i32>} : memref<256x160xf32, #tpu.memory_space<vmem>>, vector<16x160xf32>,
    %c0_10 = arith.constant 0 : index
    %c0_11 = arith.constant 0 : index
    %c3 = arith.constant 3 : index
    %9 = vector.load %arg1[%c0_10, %c0_11, %c3] : memref<1x16x176xf32, #tpu.memory_space<vmem>>, vector<1x16x160xf32>
    %10 = vector.shape_cast %9 : vector<1x16x160xf32> to vector<16x160xf32>
    %c48 = arith.constant 48 : index
    %c0_12 = arith.constant 0 : index
    %11 = vector.load %arg6[%c48, %c0_12] : memref<256x160xf32, #tpu.memory_space<vmem>>, vector<16x160xf32>
    tpu.vector_store %arg6[%c48, %c0_12], %10 {strides = array<i32>} : memref<256x160xf32, #tpu.memory_space<vmem>>, vector<16x160xf32>,
    %c0_13 = arith.constant 0 : index
    %c0_14 = arith.constant 0 : index
    %c4 = arith.constant 4 : index
    %12 = vector.load %arg1[%c0_13, %c0_14, %c4] : memref<1x16x176xf32, #tpu.memory_space<vmem>>, vector<1x16x160xf32>
    %13 = vector.shape_cast %12 : vector<1x16x160xf32> to vector<16x160xf32>
    %c64 = arith.constant 64 : index
    %c0_15 = arith.constant 0 : index
    %14 = vector.load %arg6[%c64, %c0_15] : memref<256x160xf32, #tpu.memory_space<vmem>>, vector<16x160xf32>
    tpu.vector_store %arg6[%c64, %c0_15], %13 {strides = array<i32>} : memref<256x160xf32, #tpu.memory_space<vmem>>, vector<16x160xf32>,
    %c0_16 = arith.constant 0 : index
    %c0_17 = arith.constant 0 : index
    %c5 = arith.constant 5 : index
    %15 = vector.load %arg1[%c0_16, %c0_17, %c5] : memref<1x16x176xf32, #tpu.memory_space<vmem>>, vector<1x16x160xf32>
    %16 = vector.shape_cast %15 : vector<1x16x160xf32> to vector<16x160xf32>
    %c80 = arith.constant 80 : index
    %c0_18 = arith.constant 0 : index
    %17 = vector.load %arg6[%c80, %c0_18] : memref<256x160xf32, #tpu.memory_space<vmem>>, vector<16x160xf32>
    tpu.vector_store %arg6[%c80, %c0_18], %16 {strides = array<i32>} : memref<256x160xf32, #tpu.memory_space<vmem>>, vector<16x160xf32>,
    %c0_19 = arith.constant 0 : index
    %c0_20 = arith.constant 0 : index
    %c6 = arith.constant 6 : index
    %18 = vector.load %arg1[%c0_19, %c0_20, %c6] : memref<1x16x176xf32, #tpu.memory_space<vmem>>, vector<1x16x160xf32>
    %19 = vector.shape_cast %18 : vector<1x16x160xf32> to vector<16x160xf32>
    %c96 = arith.constant 96 : index
    %c0_21 = arith.constant 0 : index
    %20 = vector.load %arg6[%c96, %c0_21] : memref<256x160xf32, #tpu.memory_space<vmem>>, vector<16x160xf32>
    tpu.vector_store %arg6[%c96, %c0_21], %19 {strides = array<i32>} : memref<256x160xf32, #tpu.memory_space<vmem>>, vector<16x160xf32>,
    %c0_22 = arith.constant 0 : index
    %c0_23 = arith.constant 0 : index
    %c7 = arith.constant 7 : index
    %21 = vector.load %arg1[%c0_22, %c0_23, %c7] : memref<1x16x176xf32, #tpu.memory_space<vmem>>, vector<1x16x160xf32>
    %22 = vector.shape_cast %21 : vector<1x16x160xf32> to vector<16x160xf32>
    %c112 = arith.constant 112 : index
    %c0_24 = arith.constant 0 : index
    %23 = vector.load %arg6[%c112, %c0_24] : memref<256x160xf32, #tpu.memory_space<vmem>>, vector<16x160xf32>
    tpu.vector_store %arg6[%c112, %c0_24], %22 {strides = array<i32>} : memref<256x160xf32, #tpu.memory_space<vmem>>, vector<16x160xf32>,
    %c0_25 = arith.constant 0 : index
    %c0_26 = arith.constant 0 : index
    %c8 = arith.constant 8 : index
    %24 = vector.load %arg1[%c0_25, %c0_26, %c8] : memref<1x16x176xf32, #tpu.memory_space<vmem>>, vector<1x16x160xf32>
    %25 = vector.shape_cast %24 : vector<1x16x160xf32> to vector<16x160xf32>
    %c128 = arith.constant 128 : index
    %c0_27 = arith.constant 0 : index
    %26 = vector.load %arg6[%c128, %c0_27] : memref<256x160xf32, #tpu.memory_space<vmem>>, vector<16x160xf32>
    tpu.vector_store %arg6[%c128, %c0_27], %25 {strides = array<i32>} : memref<256x160xf32, #tpu.memory_space<vmem>>, vector<16x160xf32>,
    %c0_28 = arith.constant 0 : index
    %c0_29 = arith.constant 0 : index
    %c9 = arith.constant 9 : index
    %27 = vector.load %arg1[%c0_28, %c0_29, %c9] : memref<1x16x176xf32, #tpu.memory_space<vmem>>, vector<1x16x160xf32>
    %28 = vector.shape_cast %27 : vector<1x16x160xf32> to vector<16x160xf32>
    %c144 = arith.constant 144 : index
    %c0_30 = arith.constant 0 : index
    %29 = vector.load %arg6[%c144, %c0_30] : memref<256x160xf32, #tpu.memory_space<vmem>>, vector<16x160xf32>
    tpu.vector_store %arg6[%c144, %c0_30], %28 {strides = array<i32>} : memref<256x160xf32, #tpu.memory_space<vmem>>, vector<16x160xf32>,
    %c0_31 = arith.constant 0 : index
    %c0_32 = arith.constant 0 : index
    %c10 = arith.constant 10 : index
    %30 = vector.load %arg1[%c0_31, %c0_32, %c10] : memref<1x16x176xf32, #tpu.memory_space<vmem>>, vector<1x16x160xf32>
    %31 = vector.shape_cast %30 : vector<1x16x160xf32> to vector<16x160xf32>
    %c160 = arith.constant 160 : index
    %c0_33 = arith.constant 0 : index
    %32 = vector.load %arg6[%c160, %c0_33] : memref<256x160xf32, #tpu.memory_space<vmem>>, vector<16x160xf32>
    tpu.vector_store %arg6[%c160, %c0_33], %31 {strides = array<i32>} : memref<256x160xf32, #tpu.memory_space<vmem>>, vector<16x160xf32>,
    %c0_34 = arith.constant 0 : index
    %c0_35 = arith.constant 0 : index
    %c11 = arith.constant 11 : index
    %33 = vector.load %arg1[%c0_34, %c0_35, %c11] : memref<1x16x176xf32, #tpu.memory_space<vmem>>, vector<1x16x160xf32>
    %34 = vector.shape_cast %33 : vector<1x16x160xf32> to vector<16x160xf32>
    %c176 = arith.constant 176 : index
    %c0_36 = arith.constant 0 : index
    %35 = vector.load %arg6[%c176, %c0_36] : memref<256x160xf32, #tpu.memory_space<vmem>>, vector<16x160xf32>
    tpu.vector_store %arg6[%c176, %c0_36], %34 {strides = array<i32>} : memref<256x160xf32, #tpu.memory_space<vmem>>, vector<16x160xf32>,
    %c0_37 = arith.constant 0 : index
    %c0_38 = arith.constant 0 : index
    %c12 = arith.constant 12 : index
    %36 = vector.load %arg1[%c0_37, %c0_38, %c12] : memref<1x16x176xf32, #tpu.memory_space<vmem>>, vector<1x16x160xf32>
    %37 = vector.shape_cast %36 : vector<1x16x160xf32> to vector<16x160xf32>
    %c192 = arith.constant 192 : index
    %c0_39 = arith.constant 0 : index
    %38 = vector.load %arg6[%c192, %c0_39] : memref<256x160xf32, #tpu.memory_space<vmem>>, vector<16x160xf32>
    tpu.vector_store %arg6[%c192, %c0_39], %37 {strides = array<i32>} : memref<256x160xf32, #tpu.memory_space<vmem>>, vector<16x160xf32>,
    %c0_40 = arith.constant 0 : index
    %c0_41 = arith.constant 0 : index
    %c13 = arith.constant 13 : index
    %39 = vector.load %arg1[%c0_40, %c0_41, %c13] : memref<1x16x176xf32, #tpu.memory_space<vmem>>, vector<1x16x160xf32>
    %40 = vector.shape_cast %39 : vector<1x16x160xf32> to vector<16x160xf32>
    %c208 = arith.constant 208 : index
    %c0_42 = arith.constant 0 : index
    %41 = vector.load %arg6[%c208, %c0_42] : memref<256x160xf32, #tpu.memory_space<vmem>>, vector<16x160xf32>
    tpu.vector_store %arg6[%c208, %c0_42], %40 {strides = array<i32>} : memref<256x160xf32, #tpu.memory_space<vmem>>, vector<16x160xf32>,
    %c0_43 = arith.constant 0 : index
    %c0_44 = arith.constant 0 : index
    %c14 = arith.constant 14 : index
    %42 = vector.load %arg1[%c0_43, %c0_44, %c14] : memref<1x16x176xf32, #tpu.memory_space<vmem>>, vector<1x16x160xf32>
    %43 = vector.shape_cast %42 : vector<1x16x160xf32> to vector<16x160xf32>
    %c224 = arith.constant 224 : index
    %c0_45 = arith.constant 0 : index
    %44 = vector.load %arg6[%c224, %c0_45] : memref<256x160xf32, #tpu.memory_space<vmem>>, vector<16x160xf32>
    tpu.vector_store %arg6[%c224, %c0_45], %43 {strides = array<i32>} : memref<256x160xf32, #tpu.memory_space<vmem>>, vector<16x160xf32>,
    %c0_46 = arith.constant 0 : index
    %c0_47 = arith.constant 0 : index
    %c15 = arith.constant 15 : index
    %45 = vector.load %arg1[%c0_46, %c0_47, %c15] : memref<1x16x176xf32, #tpu.memory_space<vmem>>, vector<1x16x160xf32>
    %46 = vector.shape_cast %45 : vector<1x16x160xf32> to vector<16x160xf32>
    %c240 = arith.constant 240 : index
    %c0_48 = arith.constant 0 : index
    %47 = vector.load %arg6[%c240, %c0_48] : memref<256x160xf32, #tpu.memory_space<vmem>>, vector<16x160xf32>
    tpu.vector_store %arg6[%c240, %c0_48], %46 {strides = array<i32>} : memref<256x160xf32, #tpu.memory_space<vmem>>, vector<16x160xf32>,
    %c0_49 = arith.constant 0 : index
    %c0_50 = arith.constant 0 : index
    %48 = vector.load %arg2[%c0_49, %c0_50] : memref<16x256xf32, #tpu.memory_space<vmem>>, vector<16x256xf32>
    %c0_51 = arith.constant 0 : index
    %c0_52 = arith.constant 0 : index
    %49 = vector.load %arg6[%c0_51, %c0_52] : memref<256x160xf32, #tpu.memory_space<vmem>>, vector<256x160xf32>
    %cst = arith.constant dense<0.000000e+00> : vector<16x160xf32>
    %50 = tpu.matmul %48, %49, %cst {dimension_numbers = #tpu.dot_dimension_numbers<[1], [0], [0], [1], [0, 0, 1, 1], [], []>} : vector<16x256xf32>, vector<256x160xf32>, vector<16x160xf32> -> vector<16x160xf32>
    %c0_53 = arith.constant 0 : index
    %c0_54 = arith.constant 0 : index
    %51 = vector.load %arg3[%c0_53, %c0_54] : memref<16x1xf32, #tpu.memory_space<vmem>>, vector<16x1xf32>
    %52 = vector.broadcast %51 : vector<16x1xf32> to vector<16x160xf32>
    %53 = arith.addf %50, %52 : vector<16x160xf32>
    %cst_55 = arith.constant 0.000000e+00 : f32
    %54 = vector.broadcast %cst_55 : f32 to vector<16x160xf32>
    %55 = arith.cmpf ogt, %53, %54 : vector<16x160xf32>
    %cst_56 = arith.constant 0.000000e+00 : f32
    %56 = vector.broadcast %cst_56 : f32 to vector<16x160xf32>
    %57 = arith.minimumf %53, %56 : vector<16x160xf32>
    %58 = math.exp %57 : vector<16x160xf32>
    %cst_57 = arith.constant 1.000000e+00 : f32
    %59 = vector.broadcast %cst_57 : f32 to vector<16x160xf32>
    %60 = arith.subf %58, %59 : vector<16x160xf32>
    %61 = arith.select %55, %53, %60 : vector<16x160xi1>, vector<16x160xf32>
    %c0_58 = arith.constant 0 : index
    %c0_59 = arith.constant 0 : index
    %62 = vector.load %arg4[%c0_58, %c0_59] : memref<160x16xf32, #tpu.memory_space<vmem>>, vector<160x16xf32>
    %cst_60 = arith.constant dense<0.000000e+00> : vector<16x16xf32>
    %63 = tpu.matmul %61, %62, %cst_60 {dimension_numbers = #tpu.dot_dimension_numbers<[1], [0], [0], [1], [0, 0, 1, 1], [], []>} : vector<16x160xf32>, vector<160x16xf32>, vector<16x16xf32> -> vector<16x16xf32>
    %c0_61 = arith.constant 0 : index
    %c0_62 = arith.constant 0 : index
    %c0_63 = arith.constant 0 : index
    %64 = vector.load %arg5[%c0_61, %c0_62, %c0_63] : memref<1x16x16xf32, #tpu.memory_space<vmem>>, vector<1x16x16xf32>
    %65 = vector.shape_cast %64 : vector<1x16x16xf32> to vector<16x16xf32>
    %66 = vector.shape_cast %63 : vector<16x16xf32> to vector<1x16x16xf32>
    tpu.vector_store %arg5[%c0_61, %c0_62, %c0_63], %66 {strides = array<i32>} : memref<1x16x16xf32, #tpu.memory_space<vmem>>, vector<1x16x16xf32>,
    return
  }
  func.func @transform_0(%arg0: i32) -> (i32, i32, i32) {
    %c0_i32 = arith.constant 0 : i32
    %c0_i32_0 = arith.constant 0 : i32
    %c0_i32_1 = arith.constant 0 : i32
    return %arg0, %c0_i32, %c0_i32_0 : i32, i32, i32
  }
  func.func @transform_1(%arg0: i32) -> (i32, i32) {
    %c0_i32 = arith.constant 0 : i32
    %c0_i32_0 = arith.constant 0 : i32
    %c0_i32_1 = arith.constant 0 : i32
    return %c0_i32, %c0_i32_0 : i32, i32
  }
  func.func @transform_2(%arg0: i32) -> (i32, i32) {
    %c0_i32 = arith.constant 0 : i32
    %c0_i32_0 = arith.constant 0 : i32
    %c0_i32_1 = arith.constant 0 : i32
    return %c0_i32, %c0_i32_0 : i32, i32
  }
  func.func @transform_3(%arg0: i32) -> (i32, i32) {
    %c0_i32 = arith.constant 0 : i32
    %c0_i32_0 = arith.constant 0 : i32
    %c0_i32_1 = arith.constant 0 : i32
    return %c0_i32, %c0_i32_0 : i32, i32
  }
  func.func @transform_4(%arg0: i32) -> (i32, i32, i32) {
    %c0_i32 = arith.constant 0 : i32
    %c0_i32_0 = arith.constant 0 : i32
    %c0_i32_1 = arith.constant 0 : i32
    return %arg0, %c0_i32, %c0_i32_0 : i32, i32, i32
  }
}

</mosaic_0001>

<bundles_post_ra>
// kernel: tpu_custom_call.1
= control target key start
LH: loop header
LB: loop body
LE: loop exit
PB: predicated region body
PF: predicated region fallthrough
CT: control target
= control target key end

     0   :  { %9 = vsyncpa [#allocation4], 0  ;;  %s1565_s0 = inlined_call_operand.vmem [shape: f32[2,16,176], index: 0, kind: input, shape index: {}]   ;;  %s1566_s1 = inlined_call_operand.vmem [shape: f32[16,256], index: 1, kind: input, shape index: {}]   ;;  %s1567_s2 = inlined_call_operand.vmem [shape: f32[16,1], index: 2, kind: input, shape index: {}]   ;;  %s1568_s3 = inlined_call_operand.vmem [shape: f32[160,16], index: 3, kind: input, shape index: {}]   ;;  %s1569_s4 = inlined_call_operand.hbm [shape: f32[2,16,16], index: 4, kind: output, shape index: {}]  }
   0x1   :  { %11 = vsyncpa [#allocation4 + $0x1], 0  ;;  %s1262_s15 = smov 0   ;;  %s1264_s16 = smov 0  }
   0x2   :  { %s1266_s17 = smov 0   ;;  %s1268_s18 = smov 0  }
   0x3 LB: > { %s1283_s19 = sadd.s32 4294967295, %s1215_s18   ;;  %s971_s20 = sadd.s32 4294967294, %s1215_s18   ;;  %s1215_s18 = sphi %s1268_s18, %s1575_s18   ;;  %s1211_s17 = sphi %s1266_s17, %s1574_s17   ;;  %s1207_s16 = sphi %s1264_s16, %s1573_s16   ;;  %s1203_s15 = sphi %s1262_s15, %s1572_s15  }
   0x4   : > { %s1287_s21 = sadd.s32 1, %s1215_s18   ;;  %s113_s22 = sadd.s32 1, %s1211_s17 }
   0x5   : > { %s110_s23 = ssub.s32 %s1215_s18, %s1287_s21  ;;  %p123_p0 = scmp.ne.s32.totalorder %s1211_s17, %s1207_s16 }
   0x6   : > { %p111_p1 = scmp.eq.s32.totalorder %s110_s23, 0  ;;  %p124_p2 = scmp.eq.s32.totalorder %s1283_s19, 1 }
   0x7   : > { %p129_p3 = scmp.ne.s32.totalorder %s1207_s16, %s1203_s15  ;;  %p130_p4 = scmp.eq.s32.totalorder %s971_s20, 1 }
   0x8   : > { %s1298_s24 = scalar_select %p111_p1, %s1211_s17, %s113_s22  }
   0x9   : > { %p1300_p5 = por %p124_p2, %p123_p0  ;;  %p1304_p6 = por %p130_p4, %p129_p3 }
   0xa   : > { %p974_p7 = scmp.ge.s32.totalorder %s1215_s18, 1  ;;  %p165_p8 = scmp.lt.s32.totalorder %s1215_s18, 3 }
   0xc   : > { %p166_p9 = pnand %p974_p7, %p165_p8 }
   0xd   : > { %p191_p10 = scmp.lt.s32.totalorder (!%p166_p9), %s1283_s19, 1  ;;  %vm201_vm0 = vcmask (!%p166_p9), 261120   ;;  %s1217_s6 = smov (!%p166_p9), 127   ;;  %v611_v10 = vld [vmem:[%s1566_s1 + $0x8] sm:$0xff] (!%p166_p9)  ;;  %vm221_vm1 = vcmask (!%p166_p9), 1039360   ;;  %vm248_vm2 = vcmask (!%p166_p9), 1031168  }
   0xe   : > { %169 = sbr.rel (%p166_p9) target bundleno = 736 (0x2e0), region = 36  ;;  %s1218_s7 = smov (!%p166_p9), 126   ;;  %754 = vmatprep.mubr.f32.mxu0 (!%p166_p9), %v611_v10  ;;  %v678_v15 = vld [vmem:[%s1567_s2] sm:$0xff] (!%p166_p9)  ;;  %v679_v16 = vld [vmem:[%s1567_s2 + $0x8] sm:$0xff] (!%p166_p9)  ;;  %v1232_v20 = vmov (!%p166_p9), 0   ;;  %v793_v22 = vld [vmem:[%s1568_s3 + $0x10] sm:$0xff] (!%p166_p9) }
   0xf   : > { %s1219_s8 = smov (!%p166_p9), 125   ;;  %s1220_s9 = smov (!%p166_p9), 124   ;;  %v791_v17 = vld [vmem:[%s1568_s3] sm:$0xff] (!%p166_p9)  ;;  %1143 = vset.pattern.permute.xlu0 (!%p166_p9), %v1232_v20  ;;  %1144 = vset.pattern.permute.xlu1 (!%p166_p9), %v1232_v20  ;;  %v792_v21 = vld [vmem:[%s1568_s3 + $0x8] sm:$0xff] (!%p166_p9)  ;;  %v794_v23 = vld [vmem:[%s1568_s3 + $0x18] sm:$0xff] (!%p166_p9)  ;;  %v1233_v26 = vmov (!%p166_p9), 0.0|0.0  }
  0x10   : > { %s1221_s10 = smov (!%p166_p9), 123   ;;  %s1222_s11 = smov (!%p166_p9), 122   ;;  %v1056_v25 = vpack.c.bf16 (!%p166_p9), %v792_v21, %v791_v17  ;;  %1055 = vmatprep.subr.bf16.mxu1 (!%p166_p9), %v1233_v26  ;;  %v1059_v27 = vpack.c.bf16 (!%p166_p9), %v794_v23, %v793_v22  ;;  %v795_v28 = vld [vmem:[%s1568_s3 + $0x20] sm:$0xff] (!%p166_p9)  ;;  %v796_v33 = vld [vmem:[%s1568_s3 + $0x28] sm:$0xff] (!%p166_p9)  ;;  %vm275_vm3 = vcmask (!%p166_p9), 1022976   ;;  %v797_v40 = vld [vmem:[%s1568_s3 + $0x30] sm:$0xff] (!%p166_p9) }
  0x11   : > { %s1223_s12 = smov (!%p166_p9), 121   ;;  %s1224_s13 = smov (!%p166_p9), 120   ;;  %v1062_v37 = vpack.c.bf16 (!%p166_p9), %v796_v33, %v795_v28  ;;  %v798_v41 = vld [vmem:[%s1568_s3 + $0x38] sm:$0xff] (!%p166_p9)  ;;  %v799_v44 = vld [vmem:[%s1568_s3 + $0x40] sm:$0xff] (!%p166_p9)  ;;  %v800_v49 = vld [vmem:[%s1568_s3 + $0x48] sm:$0xff] (!%p166_p9)  ;;  %vm302_vm4 = vcmask (!%p166_p9), 1014784  }
  0x12   : > { %s1225_s14 = smov (!%p166_p9), 119   ;;  %s1226_s20 = smov (!%p166_p9), 118   ;;  %1057 = vmatpush1.bf16.msra.mxu1 (!%p166_p9), %v1056_v25  ;;  %v1065_v43 = vpack.c.bf16 (!%p166_p9), %v798_v41, %v797_v40  ;;  %v1068_v53 = vpack.c.bf16 (!%p166_p9), %v800_v49, %v799_v44  ;;  %vm329_vm5 = vcmask (!%p166_p9), 1006592   ;;  %vm356_vm6 = vcmask (!%p166_p9), 998400  }
  0x13   : > { %s1227_s22 = smov (!%p166_p9), 117   ;;  %s1228_s23 = smov (!%p166_p9), 116   ;;  %1058 = vmatprep.subr.bf16.mxu1 (!%p166_p9), %v1233_v26  ;;  %vm383_vm7 = vcmask (!%p166_p9), 990208   ;;  %vm410_vm8 = vcmask (!%p166_p9), 982016   ;;  %vm437_vm9 = vcmask (!%p166_p9), 973824   ;;  %vm464_vm10 = vcmask (!%p166_p9), 965632  }
  0x14   : > { %s1231_s29 = smov (!%p166_p9), 113   ;;  %vm491_vm11 = vcmask (!%p166_p9), 957440   ;;  %vm518_vm12 = vcmask (!%p166_p9), 949248   ;;  %vm545_vm13 = vcmask (!%p166_p9), 941056   ;;  %vm572_vm14 = vcmask (!%p166_p9), 932864  }
  0x15   : > { %s192_s27 = scalar_select %p191_p10, %s1283_s19, 1  ;;  %vm599_vm15 = vcmask 924672  }
  0x16   : > { %1060 = vmatpush1.bf16.msra.mxu1 %v1059_v27 }
  0x17   : > { %s989_s28 = sshll.u32 %s192_s27, 5  ;;  %s1229_s27 = smov 115   ;;  %1061 = vmatprep.subr.bf16.mxu1 %v1233_v26 }
  0x18   : > { %s195_s5 = scalar_lea.vmem %s1565_s0, %s989_s28  ;;  %s1230_s28 = smov 114  }
  0x19   : > { %v1315_v0 = vld [vmem:[%s195_s5 + $0x10] sm:$0xff]  ;;  %v1317_v1 = vld [vmem:[%s195_s5] sm:$0xff]  ;;  %v1319_v2 = vld [vmem:[%s195_s5 + $0x18] sm:$0xff] }
  0x1a   : > { %217 = vrot.lane.b32.xlu1 %v1315_v0, %s1217_s6  ;;  %213 = vrot.lane.b32.xlu0 %v1317_v1, %s1217_s6  ;;  %v1323_v3 = vld [vmem:[%s195_s5 + $0x8] sm:$0xff]  ;;  %204 = vst.msk [vmem:[#allocation2 + $0x18] sm:$0xff] %vm201_vm0, %v1319_v2  ;;  %v993_v7 = vpack.c.bf16 %v1315_v0, %v1317_v1  ;;  %s188_s5 = sand.u32 1, %s1207_s16  }
  0x1b   : > { %202 = vst.msk [vmem:[#allocation2 + $0x8] sm:$0xff] %vm201_vm0, %v1323_v3  ;;  %1063 = vmatpush1.bf16.msra.mxu1 %v1062_v37 }
  0x1c   : > { %1064 = vmatprep.subr.bf16.mxu1 %v1233_v26 }
  0x1e   : > { %219 = vrot.lane.b32.xlu1 %v1319_v2, %s1217_s6  ;;  %215 = vrot.lane.b32.xlu0 %v1323_v3, %s1217_s6  ;;  %s975_s6 = sshll.u32 %s188_s5, 4 }
  0x1f   : > { %1066 = vmatpush1.bf16.msra.mxu1 %v1065_v43 }
  0x20   : > { %1067 = vmatprep.subr.bf16.mxu1 %v1233_v26 }
  0x21   : > { %v617_v4 = vld [vmem:[#allocation2 + $0x18] sm:$0xff] }
  0x22   : > { %242 = vrot.lane.b32.xlu1 %v1323_v3, %s1218_s7  ;;  %240 = vrot.lane.b32.xlu0 %v1317_v1, %s1218_s7  ;;  %v615_v5 = vld [vmem:[#allocation2 + $0x8] sm:$0xff] }
  0x23   : > { %v991_v6 = vpack.c.bf16 %v617_v4, %v615_v5  ;;  %1069 = vmatpush1.bf16.msra.mxu1 %v1068_v53 }
  0x24   : > { %1070 = vmatprep.subr.bf16.mxu1 %v1233_v26 }
  0x25   : > { %992 = vmatprep.subr.bf16.mxu0 %v991_v6 }
  0x26   : > { %246 = vrot.lane.b32.xlu1 %v1319_v2, %s1218_s7  ;;  %244 = vrot.lane.b32.xlu0 %v1315_v0, %s1218_s7  ;;  %s190_s7 = scalar_lea.vmem [#allocation3], %s975_s6 }
  0x27   : > { %994 = vmatpush1.bf16.msra.mxu0 %v993_v7 }
  0x2a   : > { %269 = vrot.lane.b32.xlu1 %v1323_v3, %s1219_s8  ;;  %267 = vrot.lane.b32.xlu0 %v1317_v1, %s1219_s8 }
  0x2e   : > { %273 = vrot.lane.b32.xlu1 %v1319_v2, %s1219_s8  ;;  %271 = vrot.lane.b32.xlu0 %v1315_v0, %s1219_s8  ;;  %s909_s8 = sshll.u32 %s190_s7, 4  ;;  %s1517_s8 = int_to_ptr.vmem [resolvable:$true] %s909_s8 }
  0x32   : > { %296 = vrot.lane.b32.xlu1 %v1323_v3, %s1220_s9  ;;  %294 = vrot.lane.b32.xlu0 %v1317_v1, %s1220_s9 }
  0x36   : > { %300 = vrot.lane.b32.xlu1 %v1319_v2, %s1220_s9  ;;  %298 = vrot.lane.b32.xlu0 %v1315_v0, %s1220_s9  ;;  %s990_s9 = sshll.u32 %s1283_s19, 8  ;;  %s1234_s19 = smov [#allocation3]  }
  0x3a   : > { %323 = vrot.lane.b32.xlu1 %v1323_v3, %s1221_s10  ;;  %321 = vrot.lane.b32.xlu0 %v1317_v1, %s1221_s10 }
  0x3e   : > { %327 = vrot.lane.b32.xlu1 %v1319_v2, %s1221_s10  ;;  %325 = vrot.lane.b32.xlu0 %v1315_v0, %s1221_s10 }
  0x42   : > { %350 = vrot.lane.b32.xlu1 %v1323_v3, %s1222_s11  ;;  %348 = vrot.lane.b32.xlu0 %v1317_v1, %s1222_s11 }
  0x46   : > { %354 = vrot.lane.b32.xlu1 %v1319_v2, %s1222_s11  ;;  %352 = vrot.lane.b32.xlu0 %v1315_v0, %s1222_s11 }
  0x4a   : > { %377 = vrot.lane.b32.xlu1 %v1323_v3, %s1223_s12  ;;  %375 = vrot.lane.b32.xlu0 %v1317_v1, %s1223_s12 }
  0x4e   : > { %381 = vrot.lane.b32.xlu1 %v1319_v2, %s1223_s12  ;;  %379 = vrot.lane.b32.xlu0 %v1315_v0, %s1223_s12  ;;  %s1522_s12 = scalar_lea.hbm %s1569_s4, %s990_s9 }
  0x52   : > { %404 = vrot.lane.b32.xlu1 %v1323_v3, %s1224_s13  ;;  %402 = vrot.lane.b32.xlu0 %v1317_v1, %s1224_s13 }
  0x56   : > { %408 = vrot.lane.b32.xlu1 %v1319_v2, %s1224_s13  ;;  %406 = vrot.lane.b32.xlu0 %v1315_v0, %s1224_s13  ;;  %s1524_s13 = scalar_lea.sflag [#allocation4], %s188_s5 }
  0x5a   : > { %431 = vrot.lane.b32.xlu1 %v1323_v3, %s1225_s14  ;;  %429 = vrot.lane.b32.xlu0 %v1317_v1, %s1225_s14 }
  0x5e   : > { %435 = vrot.lane.b32.xlu1 %v1319_v2, %s1225_s14  ;;  %433 = vrot.lane.b32.xlu0 %v1315_v0, %s1225_s14  ;;  %s1153_s14 = scalar_lea.vmem %s1517_s8, 256 }
  0x5f   : > { %p1154_p11 = scmp.ne.s32.totalorder %s1517_s8, %s1153_s14 }
  0x61   : > { %p1155_p12 = pnand %p1154_p11, %p1300_p5 }
  0x62   : > { %458 = vrot.lane.b32.xlu1 %v1323_v3, %s1226_s20  ;;  %456 = vrot.lane.b32.xlu0 %v1317_v1, %s1226_s20 }
  0x63   : > { %p1156_p13 = pneg %p1155_p12 }
  0x66   : > { %462 = vrot.lane.b32.xlu1 %v1319_v2, %s1226_s20  ;;  %460 = vrot.lane.b32.xlu0 %v1315_v0, %s1226_s20  ;;  %s1157_s20 = sshll.u32 %s1234_s19, 4  ;;  %s1158_s20 = int_to_ptr.vmem [resolvable:$false] %s1157_s20 }
  0x67   : > { %p1160_p0 = scmp.lt.s32.totalorder %s1517_s8, %s1158_s20 }
  0x6a   : > { %485 = vrot.lane.b32.xlu1 %v1323_v3, %s1227_s22  ;;  %483 = vrot.lane.b32.xlu0 %v1317_v1, %s1227_s22 }
  0x6e   : > { %489 = vrot.lane.b32.xlu1 %v1319_v2, %s1227_s22  ;;  %487 = vrot.lane.b32.xlu0 %v1315_v0, %s1227_s22  ;;  %s1159_s22 = scalar_lea.vmem %s1158_s20, 512 }
  0x6f   : > { %p1161_p1 = scmp.lt.s32.totalorder %s1159_s22, %s1153_s14 }
  0x71   : > { %p1162_p2 = por %p1161_p1, %p1160_p0 }
  0x72   : > { %512 = vrot.lane.b32.xlu1 %v1323_v3, %s1228_s23  ;;  %510 = vrot.lane.b32.xlu0 %v1317_v1, %s1228_s23 }
  0x73   : > { %p1163_p3 = pnand %p1162_p2, %p1156_p13 }
  0x76   : > { %516 = vrot.lane.b32.xlu1 %v1319_v2, %s1228_s23  ;;  %514 = vrot.lane.b32.xlu0 %v1315_v0, %s1228_s23 }
  0x7a   : > { %539 = vrot.lane.b32.xlu1 %v1323_v3, %s1229_s27  ;;  %537 = vrot.lane.b32.xlu0 %v1317_v1, %s1229_s27 }
  0x7e   : > { %543 = vrot.lane.b32.xlu1 %v1319_v2, %s1229_s27  ;;  %541 = vrot.lane.b32.xlu0 %v1315_v0, %s1229_s27 }
  0x82   : > { %566 = vrot.lane.b32.xlu1 %v1323_v3, %s1230_s28  ;;  %564 = vrot.lane.b32.xlu0 %v1317_v1, %s1230_s28 }
  0x86   : > { %570 = vrot.lane.b32.xlu1 %v1319_v2, %s1230_s28  ;;  %568 = vrot.lane.b32.xlu0 %v1315_v0, %s1230_s28 }
  0x8a   : > { %593 = vrot.lane.b32.xlu1 %v1323_v3, %s1231_s29  ;;  %591 = vrot.lane.b32.xlu0 %v1317_v1, %s1231_s29 }
  0x8c   : > { %v218_v8 = vpop.permute.xlu1 %217  ;;  %v214_v9 = vpop.permute.xlu0 %213 }
  0x8e   : > { %597 = vrot.lane.b32.xlu1 %v1319_v2, %s1231_s29  ;;  %595 = vrot.lane.b32.xlu0 %v1315_v0, %s1231_s29 }
  0x90   : > { %v220_v11 = vpop.permute.xlu1 %219  ;;  %v216_v12 = vpop.permute.xlu0 %215 }
  0x91   : > { %v223_v13 = vsel %vm221_vm1, %v218_v8, %v220_v11  ;;  %231 = vst.msk [vmem:[#allocation2 + $0x38] sm:$0xff] %vm201_vm0, %v220_v11  ;;  %v222_v14 = vsel %vm221_vm1, %v214_v9, %v216_v12  ;;  %229 = vst.msk [vmem:[#allocation2 + $0x28] sm:$0xff] %vm201_vm0, %v216_v12 }
  0x92   : > { %682 = vperm.xlu0 %1143, %v678_v15   ;;  %687 = vperm.xlu1 %1144, %v679_v16   ;;  %v997_v36 = vpack.c.bf16 %v223_v13, %v222_v14 }
  0x94   : > { %v243_v18 = vpop.permute.xlu1 %242  ;;  %v241_v19 = vpop.permute.xlu0 %240 }
  0x95   : > { %256 = vst.msk [vmem:[#allocation2 + $0x48] sm:$0xff] %vm201_vm0, %v243_v18  ;;  %v249_v24 = vsel %vm248_vm2, %v241_v19, %v243_v18 }
  0x98   : > { %v247_v29 = vpop.permute.xlu1 %246  ;;  %v245_v30 = vpop.permute.xlu0 %244  ;;  %v619_v31 = vld [vmem:[#allocation2 + $0x28] sm:$0xff]  ;;  %v621_v32 = vld [vmem:[#allocation2 + $0x38] sm:$0xff] }
  0x99   : > { %258 = vst.msk [vmem:[#allocation2 + $0x58] sm:$0xff] %vm201_vm0, %v247_v29  ;;  %v250_v34 = vsel %vm248_vm2, %v245_v30, %v247_v29  ;;  %v995_v35 = vpack.c.bf16 %v621_v32, %v619_v31 }
  0x9a   : > { %v1001_v52 = vpack.c.bf16 %v250_v34, %v249_v24 }
  0x9b   : > { %996 = vmatprep.subr.bf16.mxu0 %v995_v35 }
  0x9c   : > { %v270_v38 = vpop.permute.xlu1 %269  ;;  %v268_v39 = vpop.permute.xlu0 %267  ;;  %998 = vmatpush1.bf16.msra.mxu0 %v997_v36  ;;  %v623_v47 = vld [vmem:[#allocation2 + $0x48] sm:$0xff] }
  0x9d   : > { %283 = vst.msk [vmem:[#allocation2 + $0x68] sm:$0xff] %vm201_vm0, %v270_v38  ;;  %v276_v42 = vsel %vm275_vm3, %v268_v39, %v270_v38 }
  0xa0   : > { %v274_v45 = vpop.permute.xlu1 %273  ;;  %v272_v46 = vpop.permute.xlu0 %271  ;;  %v625_v48 = vld [vmem:[#allocation2 + $0x58] sm:$0xff] }
  0xa1   : > { %285 = vst.msk [vmem:[#allocation2 + $0x78] sm:$0xff] %vm201_vm0, %v274_v45  ;;  %v277_v50 = vsel %vm275_vm3, %v272_v46, %v274_v45  ;;  %v999_v51 = vpack.c.bf16 %v625_v48, %v623_v47 }
  0xa2   : > { %v1005_v63 = vpack.c.bf16 %v277_v50, %v276_v42 }
  0xa3   : > { %1000 = vmatprep.subr.bf16.mxu0 %v999_v51 }
  0xa4   : > { %v297_v54 = vpop.permute.xlu1 %296  ;;  %v295_v55 = vpop.permute.xlu0 %294  ;;  %1002 = vmatpush1.bf16.msra.mxu0 %v1001_v52  ;;  %v627_v59 = vld [vmem:[#allocation2 + $0x68] sm:$0xff] }
  0xa5   : > { %310 = vst.msk [vmem:[#allocation2 + $0x88] sm:$0xff] %vm201_vm0, %v297_v54  ;;  %v303_v56 = vsel %vm302_vm4, %v295_v55, %v297_v54 }
  0xa8   : > { %v301_v57 = vpop.permute.xlu1 %300  ;;  %v299_v58 = vpop.permute.xlu0 %298  ;;  %v629_v60 = vld [vmem:[#allocation2 + $0x78] sm:$0xff] }
  0xa9   : > { %312 = vst.msk [vmem:[#allocation2 + $0x98] sm:$0xff] %vm201_vm0, %v301_v57  ;;  %v304_v61 = vsel %vm302_vm4, %v299_v58, %v301_v57  ;;  %v1003_v62 = vpack.c.bf16 %v629_v60, %v627_v59 }
  0xaa   : > { %v1009_v9 = vpack.c.bf16 %v304_v61, %v303_v56 }
  0xab   : > { %1004 = vmatprep.subr.bf16.mxu0 %v1003_v62 }
  0xac   : > { %v324_v0 = vpop.permute.xlu1 %323  ;;  %v322_v1 = vpop.permute.xlu0 %321  ;;  %1006 = vmatpush1.bf16.msra.mxu0 %v1005_v63  ;;  %v631_v5 = vld [vmem:[#allocation2 + $0x88] sm:$0xff] }
  0xad   : > { %337 = vst.msk [vmem:[#allocation2 + $0xa8] sm:$0xff] %vm201_vm0, %v324_v0  ;;  %v330_v2 = vsel %vm329_vm5, %v322_v1, %v324_v0 }
  0xb0   : > { %v328_v3 = vpop.permute.xlu1 %327  ;;  %v326_v4 = vpop.permute.xlu0 %325  ;;  %v633_v6 = vld [vmem:[#allocation2 + $0x98] sm:$0xff] }
  0xb1   : > { %339 = vst.msk [vmem:[#allocation2 + $0xb8] sm:$0xff] %vm201_vm0, %v328_v3  ;;  %v331_v7 = vsel %vm329_vm5, %v326_v4, %v328_v3  ;;  %v1007_v8 = vpack.c.bf16 %v633_v6, %v631_v5  ;;  %vm892_vm5 = vcmask 130048  }
  0xb2   : > { %v1013_v19 = vpack.c.bf16 %v331_v7, %v330_v2 }
  0xb3   : > { %1008 = vmatprep.subr.bf16.mxu0 %v1007_v8 }
  0xb4   : > { %v351_v10 = vpop.permute.xlu1 %350  ;;  %v349_v11 = vpop.permute.xlu0 %348  ;;  %1010 = vmatpush1.bf16.msra.mxu0 %v1009_v9  ;;  %v635_v15 = vld [vmem:[#allocation2 + $0xa8] sm:$0xff] }
  0xb5   : > { %364 = vst.msk [vmem:[#allocation2 + $0xc8] sm:$0xff] %vm201_vm0, %v351_v10  ;;  %v357_v12 = vsel %vm356_vm6, %v349_v11, %v351_v10 }
  0xb8   : > { %v355_v13 = vpop.permute.xlu1 %354  ;;  %v353_v14 = vpop.permute.xlu0 %352  ;;  %v637_v16 = vld [vmem:[#allocation2 + $0xb8] sm:$0xff] }
  0xb9   : > { %366 = vst.msk [vmem:[#allocation2 + $0xd8] sm:$0xff] %vm201_vm0, %v355_v13  ;;  %v358_v17 = vsel %vm356_vm6, %v353_v14, %v355_v13  ;;  %v1011_v18 = vpack.c.bf16 %v637_v16, %v635_v15 }
  0xba   : > { %v1017_v30 = vpack.c.bf16 %v358_v17, %v357_v12 }
  0xbb   : > { %1012 = vmatprep.subr.bf16.mxu0 %v1011_v18 }
  0xbc   : > { %v378_v20 = vpop.permute.xlu1 %377  ;;  %v376_v21 = vpop.permute.xlu0 %375  ;;  %1014 = vmatpush1.bf16.msra.mxu0 %v1013_v19  ;;  %v639_v25 = vld [vmem:[#allocation2 + $0xc8] sm:$0xff] }
  0xbd   : > { %391 = vst.msk [vmem:[#allocation2 + $0xe8] sm:$0xff] %vm201_vm0, %v378_v20  ;;  %v384_v22 = vsel %vm383_vm7, %v376_v21, %v378_v20 }
  0xc0   : > { %v382_v23 = vpop.permute.xlu1 %381  ;;  %v380_v24 = vpop.permute.xlu0 %379  ;;  %v641_v27 = vld [vmem:[#allocation2 + $0xd8] sm:$0xff] }
  0xc1   : > { %393 = vst.msk [vmem:[#allocation2 + $0xf8] sm:$0xff] %vm201_vm0, %v382_v23  ;;  %v385_v28 = vsel %vm383_vm7, %v380_v24, %v382_v23  ;;  %v1015_v29 = vpack.c.bf16 %v641_v27, %v639_v25 }
  0xc2   : > { %v1021_v40 = vpack.c.bf16 %v385_v28, %v384_v22 }
  0xc3   : > { %1016 = vmatprep.subr.bf16.mxu0 %v1015_v29 }
  0xc4   : > { %v405_v31 = vpop.permute.xlu1 %404  ;;  %v403_v32 = vpop.permute.xlu0 %402  ;;  %1018 = vmatpush1.bf16.msra.mxu0 %v1017_v30  ;;  %v643_v36 = vld [vmem:[#allocation2 + $0xe8] sm:$0xff] }
  0xc5   : > { %418 = vst.msk [vmem:[#allocation2 + $0x108] sm:$0xff] %vm201_vm0, %v405_v31  ;;  %v411_v33 = vsel %vm410_vm8, %v403_v32, %v405_v31 }
  0xc8   : > { %v409_v34 = vpop.permute.xlu1 %408  ;;  %v407_v35 = vpop.permute.xlu0 %406  ;;  %v645_v37 = vld [vmem:[#allocation2 + $0xf8] sm:$0xff] }
  0xc9   : > { %420 = vst.msk [vmem:[#allocation2 + $0x118] sm:$0xff] %vm201_vm0, %v409_v34  ;;  %v412_v38 = vsel %vm410_vm8, %v407_v35, %v409_v34  ;;  %v1019_v39 = vpack.c.bf16 %v645_v37, %v643_v36 }
  0xca   : > { %v1025_v50 = vpack.c.bf16 %v412_v38, %v411_v33 }
  0xcb   : > { %1020 = vmatprep.subr.bf16.mxu0 %v1019_v39 }
  0xcc   : > { %v432_v41 = vpop.permute.xlu1 %431  ;;  %v430_v42 = vpop.permute.xlu0 %429  ;;  %1022 = vmatpush1.bf16.msra.mxu0 %v1021_v40  ;;  %v647_v46 = vld [vmem:[#allocation2 + $0x108] sm:$0xff] }
  0xcd   : > { %445 = vst.msk [vmem:[#allocation2 + $0x128] sm:$0xff] %vm201_vm0, %v432_v41  ;;  %v438_v43 = vsel %vm437_vm9, %v430_v42, %v432_v41 }
  0xd0   : > { %v436_v44 = vpop.permute.xlu1 %435  ;;  %v434_v45 = vpop.permute.xlu0 %433  ;;  %v649_v47 = vld [vmem:[#allocation2 + $0x118] sm:$0xff] }
  0xd1   : > { %447 = vst.msk [vmem:[#allocation2 + $0x138] sm:$0xff] %vm201_vm0, %v436_v44  ;;  %v439_v48 = vsel %vm437_vm9, %v434_v45, %v436_v44  ;;  %v1023_v49 = vpack.c.bf16 %v649_v47, %v647_v46 }
  0xd2   : > { %v1029_v60 = vpack.c.bf16 %v439_v48, %v438_v43 }
  0xd3   : > { %1024 = vmatprep.subr.bf16.mxu0 %v1023_v49 }
  0xd4   : > { %v459_v51 = vpop.permute.xlu1 %458  ;;  %v457_v52 = vpop.permute.xlu0 %456  ;;  %1026 = vmatpush1.bf16.msra.mxu0 %v1025_v50  ;;  %v651_v56 = vld [vmem:[#allocation2 + $0x128] sm:$0xff] }
  0xd5   : > { %472 = vst.msk [vmem:[#allocation2 + $0x148] sm:$0xff] %vm201_vm0, %v459_v51  ;;  %v465_v53 = vsel %vm464_vm10, %v457_v52, %v459_v51  ;;  %v610_v52 = vld [vmem:[%s1566_s1] sm:$0xff] }
  0xd8   : > { %v463_v54 = vpop.permute.xlu1 %462  ;;  %v461_v55 = vpop.permute.xlu0 %460  ;;  %v653_v57 = vld [vmem:[#allocation2 + $0x138] sm:$0xff] }
  0xd9   : > { %474 = vst.msk [vmem:[#allocation2 + $0x158] sm:$0xff] %vm201_vm0, %v463_v54  ;;  %v466_v58 = vsel %vm464_vm10, %v461_v55, %v463_v54  ;;  %v1027_v59 = vpack.c.bf16 %v653_v57, %v651_v56  ;;  %v612_v54 = vld [vmem:[%s1566_s1 + $0x10] sm:$0xff]  ;;  %v802_v56 = vld [vmem:[%s1568_s3 + $0x58] sm:$0xff] }
  0xda   : > { %v1033_v6 = vpack.c.bf16 %v466_v58, %v465_v53  ;;  %v613_v53 = vld [vmem:[%s1566_s1 + $0x18] sm:$0xff]  ;;  %v801_v55 = vld [vmem:[%s1568_s3 + $0x50] sm:$0xff]  ;;  %v803_v58 = vld [vmem:[%s1568_s3 + $0x60] sm:$0xff] }
  0xdb   : > { %1028 = vmatprep.subr.bf16.mxu0 %v1027_v59  ;;  %v1071_v57 = vpack.c.bf16 %v802_v56, %v801_v55  ;;  %v804_v59 = vld [vmem:[%s1568_s3 + $0x68] sm:$0xff] }
  0xdc   : > { %v486_v61 = vpop.permute.xlu1 %485  ;;  %v484_v62 = vpop.permute.xlu0 %483  ;;  %1030 = vmatpush1.bf16.msra.mxu0 %v1029_v60  ;;  %v655_v2 = vld [vmem:[#allocation2 + $0x148] sm:$0xff]  ;;  %v1074_v60 = vpack.c.bf16 %v804_v59, %v803_v58 }
  0xdd   : > { %499 = vst.msk [vmem:[#allocation2 + $0x168] sm:$0xff] %vm201_vm0, %v486_v61  ;;  %v492_v63 = vsel %vm491_vm11, %v484_v62, %v486_v61  ;;  %1072 = vmatpush1.bf16.msra.mxu1 %v1071_v57  ;;  %v805_v61 = vld [vmem:[%s1568_s3 + $0x70] sm:$0xff]  ;;  %v806_v62 = vld [vmem:[%s1568_s3 + $0x78] sm:$0xff] }
  0xde   : > { %1073 = vmatprep.subr.bf16.mxu1 %v1233_v26 }
  0xe0   : > { %v490_v0 = vpop.permute.xlu1 %489  ;;  %v488_v1 = vpop.permute.xlu0 %487  ;;  %v657_v3 = vld [vmem:[#allocation2 + $0x158] sm:$0xff] }
  0xe1   : > { %501 = vst.msk [vmem:[#allocation2 + $0x178] sm:$0xff] %vm201_vm0, %v490_v0  ;;  %v493_v4 = vsel %vm491_vm11, %v488_v1, %v490_v0  ;;  %v1031_v5 = vpack.c.bf16 %v657_v3, %v655_v2  ;;  %1075 = vmatpush1.bf16.msra.mxu1 %v1074_v60  ;;  %v807_v0 = vld [vmem:[%s1568_s3 + $0x80] sm:$0xff]  ;;  %v808_v1 = vld [vmem:[%s1568_s3 + $0x88] sm:$0xff]  ;;  %v809_v3 = vld [vmem:[%s1568_s3 + $0x90] sm:$0xff] }
  0xe2   : > { %v1037_v16 = vpack.c.bf16 %v493_v4, %v492_v63  ;;  %1076 = vmatprep.subr.bf16.mxu1 %v1233_v26  ;;  %v1077_v63 = vpack.c.bf16 %v806_v62, %v805_v61  ;;  %v1080_v2 = vpack.c.bf16 %v808_v1, %v807_v0  ;;  %v810_v4 = vld [vmem:[%s1568_s3 + $0x98] sm:$0xff] }
  0xe3   : > { %1032 = vmatprep.subr.bf16.mxu0 %v1031_v5  ;;  %v1083_v5 = vpack.c.bf16 %v810_v4, %v809_v3 }
  0xe4   : > { %v513_v7 = vpop.permute.xlu1 %512  ;;  %v511_v8 = vpop.permute.xlu0 %510  ;;  %1034 = vmatpush1.bf16.msra.mxu0 %v1033_v6  ;;  %v659_v12 = vld [vmem:[#allocation2 + $0x168] sm:$0xff] }
  0xe5   : > { %526 = vst.msk [vmem:[#allocation2 + $0x188] sm:$0xff] %vm201_vm0, %v513_v7  ;;  %v519_v9 = vsel %vm518_vm12, %v511_v8, %v513_v7  ;;  %1078 = vmatpush1.bf16.msra.mxu1 %v1077_v63 }
  0xe6   : > { %1079 = vmatprep.subr.bf16.mxu1 %v1233_v26 }
  0xe8   : > { %v517_v10 = vpop.permute.xlu1 %516  ;;  %v515_v11 = vpop.permute.xlu0 %514  ;;  %v661_v13 = vld [vmem:[#allocation2 + $0x178] sm:$0xff] }
  0xe9   : > { %528 = vst.msk [vmem:[#allocation2 + $0x198] sm:$0xff] %vm201_vm0, %v517_v10  ;;  %v520_v14 = vsel %vm518_vm12, %v515_v11, %v517_v10  ;;  %v1035_v15 = vpack.c.bf16 %v661_v13, %v659_v12  ;;  %1081 = vmatpush1.bf16.msra.mxu1 %v1080_v2 }
  0xea   : > { %v1041_v27 = vpack.c.bf16 %v520_v14, %v519_v9  ;;  %1082 = vmatprep.subr.bf16.mxu1 %v1233_v26 }
  0xeb   : > { %1036 = vmatprep.subr.bf16.mxu0 %v1035_v15 }
  0xec   : > { %v540_v17 = vpop.permute.xlu1 %539  ;;  %v538_v18 = vpop.permute.xlu0 %537  ;;  %1038 = vmatpush1.bf16.msra.mxu0 %v1037_v16  ;;  %v663_v22 = vld [vmem:[#allocation2 + $0x188] sm:$0xff] }
  0xed   : > { %553 = vst.msk [vmem:[#allocation2 + $0x1a8] sm:$0xff] %vm201_vm0, %v540_v17  ;;  %v546_v19 = vsel %vm545_vm13, %v538_v18, %v540_v17  ;;  %1084 = vmatpush1.bf16.msra.mxu1 %v1083_v5 }
  0xf0   : > { %v544_v20 = vpop.permute.xlu1 %543  ;;  %v542_v21 = vpop.permute.xlu0 %541  ;;  %v665_v23 = vld [vmem:[#allocation2 + $0x198] sm:$0xff] }
  0xf1   : > { %555 = vst.msk [vmem:[#allocation2 + $0x1b8] sm:$0xff] %vm201_vm0, %v544_v20  ;;  %v547_v24 = vsel %vm545_vm13, %v542_v21, %v544_v20  ;;  %v1039_v25 = vpack.c.bf16 %v665_v23, %v663_v22 }
  0xf2   : > { %v1045_v37 = vpack.c.bf16 %v547_v24, %v546_v19 }
  0xf3   : > { %1040 = vmatprep.subr.bf16.mxu0 %v1039_v25 }
  0xf4   : > { %v567_v28 = vpop.permute.xlu1 %566  ;;  %v565_v29 = vpop.permute.xlu0 %564  ;;  %1042 = vmatpush1.bf16.msra.mxu0 %v1041_v27  ;;  %v667_v33 = vld [vmem:[#allocation2 + $0x1a8] sm:$0xff] }
  0xf5   : > { %580 = vst.msk [vmem:[#allocation2 + $0x1c8] sm:$0xff] %vm201_vm0, %v567_v28  ;;  %v573_v30 = vsel %vm572_vm14, %v565_v29, %v567_v28 }
  0xf8   : > { %v571_v31 = vpop.permute.xlu1 %570  ;;  %v569_v32 = vpop.permute.xlu0 %568  ;;  %v669_v34 = vld [vmem:[#allocation2 + $0x1b8] sm:$0xff] }
  0xf9   : > { %582 = vst.msk [vmem:[#allocation2 + $0x1d8] sm:$0xff] %vm201_vm0, %v571_v31  ;;  %v574_v35 = vsel %vm572_vm14, %v569_v32, %v571_v31  ;;  %v1043_v36 = vpack.c.bf16 %v669_v34, %v667_v33 }
  0xfa   : > { %v1049_v47 = vpack.c.bf16 %v574_v35, %v573_v30 }
  0xfb   : > { %1044 = vmatprep.subr.bf16.mxu0 %v1043_v36 }
  0xfc   : > { %v594_v38 = vpop.permute.xlu1 %593  ;;  %v592_v39 = vpop.permute.xlu0 %591  ;;  %1046 = vmatpush1.bf16.msra.mxu0 %v1045_v37  ;;  %v671_v43 = vld [vmem:[#allocation2 + $0x1c8] sm:$0xff] }
  0xfd   : > { %607 = vst.msk [vmem:[#allocation2 + $0x1e8] sm:$0xff] %vm201_vm0, %v594_v38  ;;  %v600_v40 = vsel %vm599_vm15, %v592_v39, %v594_v38 }
 0x100   : > { %v598_v41 = vpop.permute.xlu1 %597  ;;  %v596_v42 = vpop.permute.xlu0 %595  ;;  %v673_v44 = vld [vmem:[#allocation2 + $0x1d8] sm:$0xff] }
 0x101   : > { %609 = vst.msk [vmem:[#allocation2 + $0x1f8] sm:$0xff] %vm201_vm0, %v598_v41  ;;  %v601_v45 = vsel %vm599_vm15, %v596_v42, %v598_v41  ;;  %v1047_v46 = vpack.c.bf16 %v673_v44, %v671_v43 }
 0x102   : > { %v1053_v51 = vpack.c.bf16 %v601_v45, %v600_v40 }
 0x103   : > { %1048 = vmatprep.subr.bf16.mxu0 %v1047_v46 }
 0x104   : > { %1050 = vmatpush1.bf16.msra.mxu0 %v1049_v47  ;;  %v675_v48 = vld [vmem:[#allocation2 + $0x1e8] sm:$0xff] }
 0x108   : > { %v677_v49 = vld [vmem:[#allocation2 + $0x1f8] sm:$0xff] }
 0x109   : > { %v1051_v50 = vpack.c.bf16 %v677_v49, %v675_v48 }
 0x10b   : > { %1052 = vmatprep.subr.bf16.mxu0 %v1051_v50 }
 0x10c   : > { %1054 = vmatpush1.bf16.msra.mxu0 %v1053_v51 }
 0x10f   : > { %755 = vmatmul.mubr.f32.vlgmr.msra.gmra.mrb[0].mxu0 %v610_v52 }
 0x110   : > { %760 = vmatprep.mubr.f32.mxu0 %v613_v53 }
 0x111   : > { %v683_v6 = vpop.permute.xlu0 %682  ;;  %v688_v11 = vpop.permute.xlu1 %687 }
 0x113   : > { %761 = vmatmul.mubr.f32.gmra.mrb[2].mxu0 %v612_v54 }
 0x1e2   : > { %v756_v7 = vpop.f32.mrb[0].mxu0 }
 0x1e3   : > { %v757_v8 = vadd.f32 %v756_v7, %v683_v6  ;;  %v758_v9 = vpop.f32.mrb[1].mxu0 }
 0x1e4   : > { %v759_v10 = vadd.f32 %v758_v9, %v683_v6 }
 0x1e5   : > { %v771_v12 = vmin.f32 %v757_v8, 0.0  ;;  %vm767_vm2 = vcmp.gt.f32.partialorder %v757_v8, 0.0 }
 0x1e6   : > { %v772_v13 = vmin.f32 %v759_v10, 0.0  ;;  %v762_v14 = vpop.f32.mrb[2].mxu0  ;;  %vm768_vm1 = vcmp.gt.f32.partialorder %v759_v10, 0.0 }
 0x1e7   : > { %v775_v15 = vmul.f32 1.442695, %v771_v12  ;;  %v763_v16 = vadd.f32 %v762_v14, %v688_v11  ;;  %v764_v17 = vpop.f32.mrb[3].mxu0 }
 0x1e8   : > { %v777_v18 = vmul.f32 1.442695, %v772_v13  ;;  %v765_v19 = vadd.f32 %v764_v17, %v688_v11 }
 0x1e9   : > { %1145 = vpow2.f32 %v775_v15  ;;  %v773_v20 = vmin.f32 %v763_v16, 0.0  ;;  %vm769_vm4 = vcmp.gt.f32.partialorder %v763_v16, 0.0 }
 0x1ea   : > { %1147 = vpow2.f32 %v777_v18  ;;  %v774_v21 = vmin.f32 %v765_v19, 0.0  ;;  %vm770_vm3 = vcmp.gt.f32.partialorder %v765_v19, 0.0 }
 0x1eb   : > { %v779_v26 = vmul.f32 1.442695, %v773_v20 }
 0x1ec   : > { %v781_v22 = vmul.f32 1.442695, %v774_v21 }
 0x1ed   : > { %1149 = vpow2.f32 %v779_v26 }
 0x1ee   : > { %1151 = vpow2.f32 %v781_v22 }
 0x1f3   : > { %v1146_v23 = vpop.eup %1145 }
 0x1f4   : > { %v1148_v24 = vpop.eup %1147  ;;  %v978_v25 = vadd.f32 -1.0, %v1146_v23 }
 0x1f5   : > { %v979_v27 = vadd.f32 -1.0, %v1148_v24 }
 0x1f6   : > { %v787_v31 = vsel %vm767_vm2, %v757_v8, %v978_v25 }
 0x1f7   : > { %v1150_v28 = vpop.eup %1149  ;;  %v788_v29 = vsel %vm768_vm1, %v759_v10, %v979_v27 }
 0x1f8   : > { %v1152_v30 = vpop.eup %1151  ;;  %982 = vmatprep.mubr.msk.f32.mxu1 %vm201_vm0, %v788_v29  ;;  %v980_v32 = vadd.f32 -1.0, %v1150_v28 }
 0x1f9   : > { %882 = vmatmul.mubr.f32.vlgmr.msra.gmra.mrb[0].mxu1 %v787_v31  ;;  %v981_v33 = vadd.f32 -1.0, %v1152_v30 }
 0x1fa   : > { %v789_v35 = vsel %vm769_vm4, %v763_v16, %v980_v32 }
 0x1fb   : > { %v790_v34 = vsel %vm770_vm3, %v765_v19, %v981_v33 }
 0x1fc   : > { %983 = vmatprep.mubr.msk.f32.mxu1 %vm201_vm0, %v790_v34 }
 0x1fd   : > { %887 = vmatmul.mubr.f32.gmra.mrb[2].mxu1 %v789_v35 }
 0x2cc   : > { %v883_v36 = vpop.f32.mrb[0].mxu1 }
 0x2cd   : > { %893 = vst.msk [vmem:[%s190_s7] sm:$0xff] %vm892_vm5, %v883_v36  ;;  %v885_v37 = vpop.f32.mrb[1].mxu1 }
 0x2d0   : > { %v888_v38 = vpop.f32.mrb[2].mxu1 }
 0x2d1   : > { %894 = vst.msk [vmem:[%s190_s7 + $0x8] sm:$0xff] %vm892_vm5, %v888_v38  ;;  %v890_v39 = vpop.f32.mrb[3].mxu1 }
 0x2d2   : > { %1166 = shalt.err (!%p1163_p3)
}
 0x2d3   : > { %s1167_s23 = scalar_lea.hbm %s1522_s12, 256  ;;  %s1171_s29 = scalar_lea.hbm %s1569_s4, 512 }
 0x2d4   : > { %p1168_p4 = scmp.ne.s32.totalorder %s1522_s12, %s1167_s23  ;;  %p1172_p9 = scmp.lt.u32.totalorder %s1522_s12, %s1569_s4 }
 0x2d5   : > { %p1173_p10 = scmp.lt.u32.totalorder %s1171_s29, %s1167_s23  ;;  %p1175_p12 = scmp.lt.u32.totalorder %s1167_s23, %s1522_s12 }
 0x2d6   : > { %p1169_p7 = pnand %p1168_p4, %p1300_p5 }
 0x2d7   : > { %p1174_p11 = por %p1173_p10, %p1172_p9 }
 0x2d8   : > { %p1170_p8 = pneg %p1169_p7 }
 0x2d9   : > { %p1176_p13 = por %p1175_p12, %p1174_p11 }
 0x2db   : > { %p1177_p0 = pnand %p1176_p13, %p1170_p8 }
 0x2dd   : > { %1180 = shalt.err (!%p1177_p0)
}
 0x2de   : > { %s1235_s6 = smov 128   ;;  %s1236_s7 = smov 8  }
 0x2df   : > { %1085 = dma.vmem_to_hbm [thread:$0]  (%p1300_p5), %s1517_s8, 256, %s1522_s12, %s1524_s13, %s1235_s6, %s1235_s6, %s1236_s7  }
 0x2e0 PF: > { %p1091_p1 = scmp.ge.s32.totalorder %s1215_s18, 2  ;;  %s924_s9 = sand.u32 1, %s1203_s15  }
 0x2e1   : > { %s925_s10 = scalar_lea.sflag [#allocation4], %s924_s9 }
 0x2e2   : > { %p1088_p2 = pnand %p1091_p1, %p1304_p6 }
 0x2e4   : > { %1198 = dma.done.wait (!%p1088_p2), %s925_s10, 256  }
 0x2e5   : > { %1200 = vsyncadd (!%p1088_p2), %s925_s10, 4294967040  ;;  %p14_p3 = scmp.ge.s32.totalorder %s1287_s21, 4   ;;  %s1572_s15 = smov %s1207_s16 }
 0x2e6   : > { %s1573_s16 = smov %s1211_s17  ;;  %s1574_s17 = smov %s1298_s24 }
 0x2e7   : > { %s1575_s18 = smov %s1287_s21  ;;  %16 = sbr.rel (!%p14_p3) target bundleno = 3 (0x3), region = 71 }
 0x2ee   :  { %930 = vsyncpa [#allocation4], 1 }
 0x2ef   :  { %932 = vsyncpa [#allocation4 + $0x1], 1 }

</bundles_post_ra>
